<compile_context>
chip_gen: v7x
topology: tpu7x:2x2x1
jax: 0.10.0
libtpu: 0.0.40
codegen_flags: <defaults>
</compile_context>

<pallas_src>
import numpy as np
import jax
import jax.numpy as jnp
from jax.experimental import pallas as pl
from jax.experimental.pallas import tpu as pltpu


def _round_up(x, m):
    return ((x + m - 1) // m) * m


def _kruskal_matmul_kernel(x_ref, wt_ref, b_ref, o_ref):
    # x_ref : (TM, DEF_P)     batch tile of flattened (zero-padded) inputs
    # wt_ref: (DEF_P, ABC_P)  reconstructed Kruskal weight, transposed + padded
    # b_ref : (1, ABC_P)      bias row (f32)
    # o_ref : (TM, ABC_P)     lane-dense output tile
    acc = jnp.dot(x_ref[...], wt_ref[...], preferred_element_type=jnp.float32)
    o_ref[...] = (acc + b_ref[...]).astype(o_ref.dtype)


def kruskal_linear_forward(x, core_matrices, factor_matrices, bias,
                           in_features, out_features, *,
                           tm=512, mxu_dtype=None):
    """Exact forward of KruskalLinearLayer.

    tm        : batch row tile (rounded to a multiple of 8; batch is padded to
                a multiple of it and the pad rows are sliced away).
    mxu_dtype : if set (e.g. jnp.bfloat16), x and W are cast to this dtype for
                the MXU; accumulation and bias add stay in f32.
    """
    # ---- glue: reconstruct the dense 6-way weight (tiny, batch independent) ----
    core = jnp.einsum('ir,jr,kr,lr,mr,nr->ijklmn', *core_matrices)
    W = jnp.einsum('ijklmn,ai,bj,ck,dl,em,fn->abcdef', core, *factor_matrices)

    ABC = int(np.prod(out_features))
    DEF = int(np.prod(in_features))

    x_flat = x.reshape(-1, DEF)
    N = x_flat.shape[0]
    out_dtype = x.dtype

    # ---- lane-dense zero padding (exact: padded rows/cols contribute 0) ----
    LANE = 128
    DEF_P = _round_up(DEF, LANE)
    ABC_P = _round_up(ABC, LANE)

    TM = max(8, min(_round_up(int(tm), 8), _round_up(N, 8)))
    N_P = _round_up(N, TM)

    Wt = W.reshape(ABC, DEF).T                                   # (DEF, ABC)
    Wt_p = jnp.zeros((DEF_P, ABC_P), W.dtype).at[:DEF, :ABC].set(Wt)
    b_p = jnp.zeros((1, ABC_P), jnp.float32).at[0, :ABC].set(
        bias.astype(jnp.float32))
    x_p = jnp.zeros((N_P, DEF_P), x_flat.dtype).at[:N, :DEF].set(x_flat)

    if mxu_dtype is not None:
        x_p = x_p.astype(mxu_dtype)
        Wt_p = Wt_p.astype(mxu_dtype)

    grid = (N_P // TM,)

    in_itemsize = int(np.dtype(x_p.dtype).itemsize)
    out_itemsize = int(np.dtype(out_dtype).itemsize)
    cost = pl.CostEstimate(
        flops=2 * N_P * DEF_P * ABC_P,
        transcendentals=0,
        bytes_accessed=(N_P * DEF_P * in_itemsize          # x tiles
                        + DEF_P * ABC_P * in_itemsize      # weight (once)
                        + ABC_P * 4                        # bias (once)
                        + N_P * ABC_P * out_itemsize))     # output

    # ---- hot path in Pallas: y = x_flat @ Wt + bias, tiled over the batch ----
    y_p = pl.pallas_call(
        _kruskal_matmul_kernel,
        out_shape=jax.ShapeDtypeStruct((N_P, ABC_P), out_dtype),
        grid_spec=pltpu.PrefetchScalarGridSpec(
            num_scalar_prefetch=0,
            grid=grid,
            in_specs=[
                pl.BlockSpec((TM, DEF_P), lambda i: (i, 0)),    # x row tile
                # Weight / bias block index is (0,0) at every grid step, so the
                # pipeline keeps them resident instead of re-DMAing per step.
                pl.BlockSpec((DEF_P, ABC_P), lambda i: (0, 0)),
                pl.BlockSpec((1, ABC_P), lambda i: (0, 0)),
            ],
            out_specs=pl.BlockSpec((TM, ABC_P), lambda i: (i, 0)),
        ),
        compiler_params=pltpu.CompilerParams(
            dimension_semantics=("parallel",),
            # Explicit cap so the double-buffered tiles are sized for v7x's
            # smaller VMEM as well (actual use is ~1 MiB at TM=512).
            vmem_limit_bytes=32 * 1024 * 1024,
        ),
        cost_estimate=cost,
    )(x_p, Wt_p, b_p)

    return y_p[:N, :ABC]


def reference_forward(x, core_matrices, factor_matrices, bias,
                      in_features, out_features):
    """Pure-JAX transcription of the PyTorch forward (for validation)."""
    xr = x.reshape(-1, *in_features)
    core = jnp.einsum('ir,jr,kr,lr,mr,nr->ijklmn', *core_matrices)
    W = jnp.einsum('ijklmn,ai,bj,ck,dl,em,fn->abcdef', core, *factor_matrices)
    res = jnp.einsum('abcdef,ndef->nabc', W, xr)
    return res.reshape(-1, int(np.prod(out_features))) + bias


if __name__ == "__main__":
    # Module hyper-parameters (consistent with __init__)
    in_features = (4, 4, 2)                  # (D, E, F) -> DEF = 32
    out_features = (4, 4, 4)                 # (A, B, C) -> ABC = 64
    ranks_tucker = [3, 3, 3, 2, 2, 2]
    rank_cp = 4
    N = 2048                                 # batch: 4 grid steps at TM=512

    key = jax.random.PRNGKey(0)
    keys = jax.random.split(key, 14)

    # core_matrices[i]: (ranks_tucker[i], rank_cp), init = randn * 0.1
    core_matrices = [
        0.1 * jax.random.normal(keys[i], (ranks_tucker[i], rank_cp),
                                dtype=jnp.float32)
        for i in range(6)
    ]
    # factor_matrices: 3 x (out_features[i], ranks_tucker[i]) then
    #                  3 x (in_features[i],  ranks_tucker[i+3]), init = randn * 0.1
    factor_shapes = ([(out_features[i], ranks_tucker[i]) for i in range(3)]
                     + [(in_features[i], ranks_tucker[i + 3]) for i in range(3)])
    factor_matrices = [
        0.1 * jax.random.normal(keys[6 + i], shape, dtype=jnp.float32)
        for i, shape in enumerate(factor_shapes)
    ]
    bias = jnp.zeros((int(np.prod(out_features)),), dtype=jnp.float32)

    # Input: anything that views to (-1, D, E, F)
    x = jax.random.normal(keys[13], (N, *in_features), dtype=jnp.float32)

    y_ref = reference_forward(x, core_matrices, factor_matrices, bias,
                              in_features, out_features)

    # f32 path: exact check against the reference.
    y = kruskal_linear_forward(x, core_matrices, factor_matrices, bias,
                               in_features, out_features, tm=512)
    y = jax.block_until_ready(y)
    np.testing.assert_allclose(np.asarray(y), np.asarray(y_ref),
                               rtol=2e-2, atol=1e-12)

    # bf16-operand path (v6e/v5e MXU fast path): loose sanity check only.
    y_bf16 = kruskal_linear_forward(x, core_matrices, factor_matrices, bias,
                                    in_features, out_features, tm=512,
                                    mxu_dtype=jnp.bfloat16)
    y_bf16 = jax.block_until_ready(y_bf16)
    ref_np = np.asarray(y_ref)
    rel_err = (np.linalg.norm(np.asarray(y_bf16) - ref_np)
               / max(np.linalg.norm(ref_np), 1e-30))
    assert np.isfinite(np.asarray(y_bf16)).all() and rel_err < 5e-2, rel_err

    print("KERNEL_OK")
</pallas_src>

<mosaic_0001>
module attributes {stable_mosaic.version = 11 : i64} {
  func.func @_kruskal_matmul_kernel(%arg0: i32, %arg1: memref<512x128xf32, #tpu.memory_space<vmem>>, %arg2: memref<128x128xf32, #tpu.memory_space<vmem>>, %arg3: memref<1x128xf32, #tpu.memory_space<vmem>>, %arg4: memref<512x128xf32, #tpu.memory_space<vmem>>) attributes {dimension_semantics = [#tpu.dimension_semantics<parallel>], iteration_bounds = array<i64: 4>, scalar_prefetch = 0 : i64, scratch_operands = 0 : i64, tpu.core_type = #tpu.core_type<tc>, window_params = [{transform_indices = @transform_0, window_bounds = array<i64: 512, 128>}, {pipeline_mode = #tpu.pipeline_mode<synchronous>, transform_indices = @transform_1, window_bounds = array<i64: 128, 128>}, {pipeline_mode = #tpu.pipeline_mode<synchronous>, transform_indices = @transform_2, window_bounds = array<i64: 1, 128>}, {transform_indices = @transform_3, window_bounds = array<i64: 512, 128>}]} {
    %c0 = arith.constant 0 : index
    %c0_0 = arith.constant 0 : index
    %0 = vector.load %arg1[%c0, %c0_0] : memref<512x128xf32, #tpu.memory_space<vmem>>, vector<512x128xf32>
    %c0_1 = arith.constant 0 : index
    %c0_2 = arith.constant 0 : index
    %1 = vector.load %arg2[%c0_1, %c0_2] : memref<128x128xf32, #tpu.memory_space<vmem>>, vector<128x128xf32>
    %cst = arith.constant dense<0.000000e+00> : vector<512x128xf32>
    %2 = tpu.matmul %0, %1, %cst {dimension_numbers = #tpu.dot_dimension_numbers<[1], [0], [0], [1], [0, 0, 1, 1], [], []>} : vector<512x128xf32>, vector<128x128xf32>, vector<512x128xf32> -> vector<512x128xf32>
    %c0_3 = arith.constant 0 : index
    %c0_4 = arith.constant 0 : index
    %3 = vector.load %arg3[%c0_3, %c0_4] : memref<1x128xf32, #tpu.memory_space<vmem>>, vector<1x128xf32>
    %4 = vector.broadcast %3 : vector<1x128xf32> to vector<512x128xf32>
    %5 = arith.addf %2, %4 : vector<512x128xf32>
    %c0_5 = arith.constant 0 : index
    %c0_6 = arith.constant 0 : index
    %6 = vector.load %arg4[%c0_5, %c0_6] : memref<512x128xf32, #tpu.memory_space<vmem>>, vector<512x128xf32>
    tpu.vector_store %arg4[%c0_5, %c0_6], %5 {strides = array<i32>} : memref<512x128xf32, #tpu.memory_space<vmem>>, vector<512x128xf32>,
    return
  }
  func.func @transform_0(%arg0: i32) -> (i32, i32) {
    %c0_i32 = arith.constant 0 : i32
    %c0_i32_0 = arith.constant 0 : i32
    return %arg0, %c0_i32 : i32, i32
  }
  func.func @transform_1(%arg0: i32) -> (i32, i32) {
    %c0_i32 = arith.constant 0 : i32
    %c0_i32_0 = arith.constant 0 : i32
    %c0_i32_1 = arith.constant 0 : i32
    return %c0_i32, %c0_i32_0 : i32, i32
  }
  func.func @transform_2(%arg0: i32) -> (i32, i32) {
    %c0_i32 = arith.constant 0 : i32
    %c0_i32_0 = arith.constant 0 : i32
    %c0_i32_1 = arith.constant 0 : i32
    return %c0_i32, %c0_i32_0 : i32, i32
  }
  func.func @transform_3(%arg0: i32) -> (i32, i32) {
    %c0_i32 = arith.constant 0 : i32
    %c0_i32_0 = arith.constant 0 : i32
    return %arg0, %c0_i32 : i32, i32
  }
}

</mosaic_0001>

<bundles_post_ra>
// kernel: tpu_custom_call.1
= control target key start
LH: loop header
LB: loop body
LE: loop exit
PB: predicated region body
PF: predicated region fallthrough
CT: control target
= control target key end

     0   :  { %8 = vsyncpa [#allocation3], 0  ;;  %s1736_s0 = inlined_call_operand.hbm [shape: f32[2048,128], index: 0, kind: input, shape index: {}]   ;;  %s1737_s1 = inlined_call_operand.hbm [shape: f32[128,128], index: 1, kind: input, shape index: {}]   ;;  %s1738_s2 = inlined_call_operand.vmem [shape: f32[1,128], index: 2, kind: input, shape index: {}]   ;;  %s1739_s3 = inlined_call_operand.hbm [shape: f32[2048,128], index: 3, kind: output, shape index: {}]  }
   0x1   :  { %10 = vsyncpa [#allocation3 + $0x1], 0 }
   0x2   :  { %11 = vsyncpa [#allocation6], 0 }
   0x3   :  { %12 = vsyncpa [#allocation4], 0 }
   0x4   :  { %14 = vsyncpa [#allocation4 + $0x1], 0  ;;  %s1332_s12 = smov 0   ;;  %s1334_s13 = smov 0  }
   0x5   :  { %s1336_s14 = smov 0   ;;  %s1338_s15 = smov 0  }
   0x6 LB: > { %s1353_s16 = sadd.s32 4294967295, %s1303_s15   ;;  %s839_s17 = sadd.s32 4294967294, %s1303_s15   ;;  %s1303_s15 = sphi %s1338_s15, %s1758_s15   ;;  %s1299_s14 = sphi %s1336_s14, %s1757_s14   ;;  %s1295_s13 = sphi %s1334_s13, %s1756_s13   ;;  %s1291_s12 = sphi %s1332_s12, %s1755_s12  }
   0x7   : > { %p40_p0 = scmp.ne.s32.totalorder %s1295_s13, %s1291_s12  ;;  %p1740_p1 = scmp.eq.s32.totalorder %s1353_s16, 0 }
   0x8   : > { %p112_p3 = scmp.eq.s32.totalorder %s839_s17, 3  ;;  %p840_p5 = scmp.ge.s32.totalorder %s1303_s15, 1 }
   0x9   : > { %p1362_p4 = por %p1740_p1, %p40_p0  ;;  %p119_p7 = scmp.lt.s32.totalorder %s1303_s15, 5 }
   0xa   : > { %p1367_p6 = por %p112_p3, %p40_p0  ;;  %s1305_s21 = smov [#allocation5]  }
   0xb   : > { %s1743_s18 = scalar_select %p1362_p4, 1, 0 }
   0xc   : > { %s1744_s19 = scalar_select %p1367_p6, 1, 0 }
   0xd   : > { %p1372_p8 = pnand %p840_p5, %p119_p7  ;;  %s131_s22 = sshll.u32 %s1305_s21, 4  ;;  %s132_s22 = int_to_ptr.vmem [resolvable:$true] %s131_s22 }
   0xe   : > { %s1385_s24 = sadd.s32 1, %s1303_s15   ;;  %s27_s25 = sadd.s32 1, %s1299_s14 }
   0xf   : > { %s1745_s20 = scalar_select %p1372_p8, 1, 0 }
  0x10   : > { %p1122_p9 = pneg %p1372_p8  ;;  %s24_s26 = ssub.s32 %s1303_s15, %s1385_s24 }
  0x11   : > { %s1175_s29 = scalar_lea.hbm %s1737_s1, 2048 }
  0x12   : > { %p1380_p10 = pnand %p1122_p9, %p1740_p1  ;;  %p1176_p11 = scmp.ne.s32.totalorder %s1737_s1, %s1175_s29 }
  0x13   : > { %p1182_p3 = scmp.lt.u32.totalorder %s1175_s29, %s1737_s1 }
  0x14   : > { %p1177_p12 = pneg %p1380_p10 }
  0x16   : > { %p1178_p13 = pnand %p1177_p12, %p1176_p11 }
  0x18   : > { %p1179_p0 = pneg %p1178_p13 }
  0x1a   : > { %p1184_p5 = pnand %p1182_p3, %p1179_p0 }
  0x1c   : > { %1187 = shalt.err (!%p1184_p5)
}
  0x1d   : > { %s1188_s7 = scalar_lea.vmem %s132_s22, 2048  ;;  %p1196_p2 = scmp.lt.s32.totalorder %s132_s22, %s132_s22 }
  0x1e   : > { %p1189_p7 = scmp.ne.s32.totalorder %s132_s22, %s1188_s7  ;;  %p1197_p6 = scmp.lt.s32.totalorder %s1188_s7, %s1188_s7 }
  0x20   : > { %p1191_p9 = pnand %p1189_p7, %p1177_p12  ;;  %p1198_p4 = por %p1197_p6, %p1196_p2 }
  0x22   : > { %p1192_p1 = pneg %p1191_p9 }
  0x24   : > { %p1199_p8 = pnand %p1198_p4, %p1192_p1 }
  0x26   : > { %1202 = shalt.err (!%p1199_p8)
}
  0x27   : > { %s1306_s8 = smov 128   ;;  %s1307_s9 = smov 8  }
  0x28   : > { %1125 = dma.hbm_to_vmem [thread:$0]  (!%p1380_p10), %s1737_s1, 2048, %s132_s22, [#allocation6], %s1306_s8, %s1306_s8, %s1307_s9  }
  0x29   : > { %p25_p1 = scmp.eq.s32.totalorder %s24_s26, 0  ;;  %p34_p2 = scmp.ne.s32.totalorder %s1299_s14, %s1295_s13 }
  0x2a   : > { %p35_p4 = scmp.eq.s32.totalorder %s1303_s15, 0  ;;  %p1135_p6 = scmp.lt.s32.totalorder %s1303_s15, 4 }
  0x2b   : > { %s1414_s17 = scalar_select %p25_p1, %s1299_s14, %s27_s25  }
  0x2c   : > { %p36_p8 = por %p35_p4, %p34_p2  ;;  %p1747_p11 = scmp.eq.s32.totalorder %s1353_s16, 3 }
  0x2d   : > { %s148_s23 = sand.u32 1, %s1299_s14   ;;  %s856_s27 = sshll.u32 %s1303_s15, 13 }
  0x2e   : > { %p1418_p12 = por %p1747_p11, %p34_p2  ;;  %s843_s28 = sshll.u32 %s148_s23, 9 }
  0x2f   : > { %s1427_s4 = scalar_lea.hbm %s1736_s0, %s856_s27  ;;  %s152_s22 = scalar_lea.vmem [#allocation2], %s843_s28 }
  0x30   : > { %s159_s25 = sshll.u32 %s152_s22, 4  ;;  %p1429_p10 = pnand %p1135_p6, %p36_p8  ;;  %s1433_s25 = int_to_ptr.vmem [resolvable:$true] %s159_s25 }
  0x31   : > { %s1435_s5 = scalar_lea.sflag [#allocation3], %s148_s23  ;;  %s1203_s6 = scalar_lea.hbm %s1427_s4, 8192 }
  0x32   : > { %p1204_p13 = scmp.ne.s32.totalorder %s1427_s4, %s1203_s6  ;;  %p1205_p0 = pneg %p1429_p10 }
  0x33   : > { %s1208_s11 = scalar_lea.hbm %s1736_s0, 32768  ;;  %p1209_p7 = scmp.lt.u32.totalorder %s1427_s4, %s1736_s0 }
  0x34   : > { %p1206_p3 = pnand %p1205_p0, %p1204_p13  ;;  %p1210_p9 = scmp.lt.u32.totalorder %s1208_s11, %s1203_s6 }
  0x35   : > { %p1212_p2 = scmp.lt.u32.totalorder %s1203_s6, %s1427_s4 }
  0x36   : > { %p1207_p5 = pneg %p1206_p3  ;;  %p1211_p1 = por %p1210_p9, %p1209_p7 }
  0x38   : > { %p1213_p4 = por %p1212_p2, %p1211_p1 }
  0x3a   : > { %p1214_p6 = pnand %p1213_p4, %p1207_p5 }
  0x3c   : > { %1217 = shalt.err (!%p1214_p6)
}
  0x3d   : > { %s1218_s23 = scalar_lea.vmem %s1433_s25, 8192  ;;  %s1308_s29 = smov [#allocation2]  }
  0x3e   : > { %p1219_p8 = scmp.ne.s32.totalorder %s1433_s25, %s1218_s23  ;;  %s1223_s30 = sshll.u32 %s1308_s29, 4  ;;  %s1224_s30 = int_to_ptr.vmem [resolvable:$false] %s1223_s30 }
  0x3f   : > { %s1225_s22 = scalar_lea.vmem %s1224_s30, 16384  ;;  %p1226_p3 = scmp.lt.s32.totalorder %s1433_s25, %s1224_s30 }
  0x40   : > { %p1221_p11 = pnand %p1219_p8, %p1205_p0  ;;  %p1227_p7 = scmp.lt.s32.totalorder %s1225_s22, %s1218_s23 }
  0x42   : > { %p1222_p13 = pneg %p1221_p11  ;;  %p1228_p9 = por %p1227_p7, %p1226_p3 }
  0x44   : > { %p1229_p1 = pnand %p1228_p9, %p1222_p13 }
  0x46   : > { %1232 = shalt.err (!%p1229_p1)
}
  0x47   : > { %1129 = dma.hbm_to_vmem [thread:$0]  (!%p1429_p10), %s1427_s4, 8192, %s1433_s25, %s1435_s5, %s1306_s8, %s1306_s8, %s1307_s9  }
  0x48   : > { %p1750_p0 = scmp.ne.s32.totalorder %s1745_s20, 0 }
  0x49   : > { %s1469_s6 = sand.u32 (!%p1750_p0), 1, %s1295_s13   ;;  %p1751_p5 = scmp.ne.s32.totalorder (!%p1750_p0), %s1743_s18, 0 }
  0x4a   : > { %171 = sbr.rel (%p1750_p0) target bundleno = 410 (0x19a), region = 32  ;;  %s847_s7 = sshll.u32 (!%p1750_p0), %s1469_s6, 9 }
  0x4b   : > { %s174_s10 = scalar_lea.sflag (!%p1750_p0), [#allocation3], %s1469_s6  ;;  %s1475_s26 = scalar_lea.vmem (!%p1750_p0), [#allocation2], %s847_s7 }
  0x51   : > { %1278 = dma.done.wait (%p1751_p5), %s174_s10, 8192  }
  0x52   : > { %1280 = vsyncadd (%p1751_p5), %s174_s10, 4294959104  ;;  %p1752_p10 = scmp.eq.s32.totalorder %s1353_s16, 0 }
  0x54   : > { %1282 = dma.done.wait (%p1752_p10), [#allocation6], 2048   ;;  %p1753_p2 = pmov %p1752_p10 }
  0x55   : > { %v270_v0 = vld [vmem:[#allocation5] sm:$0xff]  ;;  %v271_v1 = vld [vmem:[#allocation5 + $0x8] sm:$0xff]  ;;  %v272_v2 = vld [vmem:[#allocation5 + $0x10] sm:$0xff]  ;;  %s1560_s8 = scalar_lea.vmem [#allocation7], %s847_s7  ;;  %s857_s9 = sshll.u32 %s1353_s16, 13 }
  0x56   : > { %1284 = vsyncadd (%p1753_p2), [#allocation6], 4294965248  ;;  %v1066_v3 = vpack.c.bf16 %v271_v1, %v270_v0  ;;  %v273_v4 = vld [vmem:[#allocation5 + $0x18] sm:$0xff]  ;;  %v274_v6 = vld [vmem:[#allocation5 + $0x20] sm:$0xff]  ;;  %s756_s4 = sshll.u32 %s1560_s8, 4  ;;  %s1685_s5 = scalar_lea.hbm %s1739_s3, %s857_s9  ;;  %s1687_s4 = int_to_ptr.vmem [resolvable:$true] %s756_s4 }
  0x57   : > { %v1070_v5 = vpack.c.bf16 %v273_v4, %v272_v2  ;;  %v275_v7 = vld [vmem:[#allocation5 + $0x28] sm:$0xff]  ;;  %v206_v9 = vld [vmem:[%s1475_s26] sm:$0xff]  ;;  %v276_v11 = vld [vmem:[#allocation5 + $0x30] sm:$0xff]  ;;  %s743_s11 = scalar_lea.sflag [#allocation4], %s1469_s6  ;;  %s1233_s27 = scalar_lea.vmem %s1687_s4, 8192 }
  0x58   : > { %1067 = vmatprep.subr.bf16.mxu0 %v1066_v3  ;;  %1098 = vmatprep.subr.bf16.mxu1 %v1066_v3  ;;  %v1074_v8 = vpack.c.bf16 %v275_v7, %v274_v6  ;;  %v238_v10 = vld [vmem:[%s1475_s26 + $0x100] sm:$0xff]  ;;  %v277_v12 = vld [vmem:[#allocation5 + $0x38] sm:$0xff]  ;;  %v279_v15 = vld [vmem:[#allocation5 + $0x48] sm:$0xff]  ;;  %p1234_p4 = scmp.ne.s32.totalorder %s1687_s4, %s1233_s27  ;;  %s1309_s28 = smov [#allocation7]  }
  0x59   : > { %1069 = vmatpush3.bf16.msra.mxu0 %v1066_v3  ;;  %1106 = vmatpush3.bf16.msra.mxu1 %v1066_v3  ;;  %v1078_v13 = vpack.c.bf16 %v277_v12, %v276_v11  ;;  %v278_v14 = vld [vmem:[#allocation5 + $0x40] sm:$0xff]  ;;  %v280_v17 = vld [vmem:[#allocation5 + $0x50] sm:$0xff]  ;;  %v281_v18 = vld [vmem:[#allocation5 + $0x58] sm:$0xff]  ;;  %s1237_s23 = sshll.u32 %s1309_s28, 4  ;;  %s1238_s23 = int_to_ptr.vmem [resolvable:$false] %s1237_s23 }
  0x5a   : > { %1071 = vmatprep.subr.bf16.mxu0 %v1070_v5  ;;  %1099 = vmatprep.subr.bf16.mxu1 %v1070_v5  ;;  %v1082_v16 = vpack.c.bf16 %v279_v15, %v278_v14  ;;  %v1086_v19 = vpack.c.bf16 %v281_v18, %v280_v17  ;;  %v282_v20 = vld [vmem:[#allocation5 + $0x60] sm:$0xff]  ;;  %v283_v21 = vld [vmem:[#allocation5 + $0x68] sm:$0xff]  ;;  %v284_v23 = vld [vmem:[#allocation5 + $0x70] sm:$0xff]  ;;  %p1235_p6 = pnand %p1234_p4, %p1418_p12  ;;  %s1239_s29 = scalar_lea.vmem %s1238_s23, 16384 }
  0x5b   : > { %970 = vmatprep.mubr.f32.mxu0 %v206_v9  ;;  %1018 = vmatprep.mubr.f32.mxu1 %v238_v10  ;;  %v1090_v22 = vpack.c.bf16 %v283_v21, %v282_v20  ;;  %v285_v24 = vld [vmem:[#allocation5 + $0x78] sm:$0xff]  ;;  %v207_v26 = vld [vmem:[%s1475_s26 + $0x8] sm:$0xff]  ;;  %v208_v28 = vld [vmem:[%s1475_s26 + $0x10] sm:$0xff]  ;;  %p1240_p11 = scmp.lt.s32.totalorder %s1687_s4, %s1238_s23  ;;  %p1241_p13 = scmp.lt.s32.totalorder %s1239_s29, %s1233_s27 }
  0x5c   : > { %v1094_v25 = vpack.c.bf16 %v285_v24, %v284_v23  ;;  %v239_v27 = vld [vmem:[%s1475_s26 + $0x108] sm:$0xff]  ;;  %v240_v29 = vld [vmem:[%s1475_s26 + $0x110] sm:$0xff]  ;;  %v209_v30 = vld [vmem:[%s1475_s26 + $0x18] sm:$0xff]  ;;  %p1236_p8 = pneg %p1235_p6 }
  0x5d   : > { %1073 = vmatpush3.bf16.msra.mxu0 %v1070_v5  ;;  %1107 = vmatpush3.bf16.msra.mxu1 %v1070_v5  ;;  %v241_v31 = vld [vmem:[%s1475_s26 + $0x118] sm:$0xff]  ;;  %v210_v32 = vld [vmem:[%s1475_s26 + $0x20] sm:$0xff]  ;;  %v211_v34 = vld [vmem:[%s1475_s26 + $0x28] sm:$0xff]  ;;  %p1242_p3 = por %p1241_p13, %p1240_p11 }
  0x5e   : > { %1075 = vmatprep.subr.bf16.mxu0 %v1074_v8  ;;  %1100 = vmatprep.subr.bf16.mxu1 %v1074_v8  ;;  %v242_v33 = vld [vmem:[%s1475_s26 + $0x120] sm:$0xff]  ;;  %v243_v35 = vld [vmem:[%s1475_s26 + $0x128] sm:$0xff]  ;;  %v212_v36 = vld [vmem:[%s1475_s26 + $0x30] sm:$0xff] }
  0x5f   : > { %v244_v37 = vld [vmem:[%s1475_s26 + $0x130] sm:$0xff]  ;;  %v213_v38 = vld [vmem:[%s1475_s26 + $0x38] sm:$0xff]  ;;  %v214_v40 = vld [vmem:[%s1475_s26 + $0x40] sm:$0xff]  ;;  %p1243_p7 = pnand %p1242_p3, %p1236_p8 }
  0x60   : > { %v245_v39 = vld [vmem:[%s1475_s26 + $0x138] sm:$0xff]  ;;  %v246_v41 = vld [vmem:[%s1475_s26 + $0x140] sm:$0xff]  ;;  %v215_v42 = vld [vmem:[%s1475_s26 + $0x48] sm:$0xff] }
  0x61   : > { %1077 = vmatpush3.bf16.msra.mxu0 %v1074_v8  ;;  %1108 = vmatpush3.bf16.msra.mxu1 %v1074_v8  ;;  %v247_v43 = vld [vmem:[%s1475_s26 + $0x148] sm:$0xff]  ;;  %v216_v44 = vld [vmem:[%s1475_s26 + $0x50] sm:$0xff]  ;;  %v217_v46 = vld [vmem:[%s1475_s26 + $0x58] sm:$0xff] }
  0x62   : > { %1079 = vmatprep.subr.bf16.mxu0 %v1078_v13  ;;  %1101 = vmatprep.subr.bf16.mxu1 %v1078_v13  ;;  %v248_v45 = vld [vmem:[%s1475_s26 + $0x150] sm:$0xff]  ;;  %v249_v47 = vld [vmem:[%s1475_s26 + $0x158] sm:$0xff]  ;;  %v218_v48 = vld [vmem:[%s1475_s26 + $0x60] sm:$0xff] }
  0x63   : > { %v250_v49 = vld [vmem:[%s1475_s26 + $0x160] sm:$0xff]  ;;  %v219_v50 = vld [vmem:[%s1475_s26 + $0x68] sm:$0xff]  ;;  %v220_v52 = vld [vmem:[%s1475_s26 + $0x70] sm:$0xff] }
  0x64   : > { %v251_v51 = vld [vmem:[%s1475_s26 + $0x168] sm:$0xff]  ;;  %v252_v53 = vld [vmem:[%s1475_s26 + $0x170] sm:$0xff]  ;;  %v221_v54 = vld [vmem:[%s1475_s26 + $0x78] sm:$0xff] }
  0x65   : > { %1081 = vmatpush3.bf16.msra.mxu0 %v1078_v13  ;;  %1109 = vmatpush3.bf16.msra.mxu1 %v1078_v13  ;;  %v253_v55 = vld [vmem:[%s1475_s26 + $0x178] sm:$0xff]  ;;  %v222_v56 = vld [vmem:[%s1475_s26 + $0x80] sm:$0xff]  ;;  %v223_v58 = vld [vmem:[%s1475_s26 + $0x88] sm:$0xff] }
  0x66   : > { %1083 = vmatprep.subr.bf16.mxu0 %v1082_v16  ;;  %1102 = vmatprep.subr.bf16.mxu1 %v1082_v16  ;;  %v254_v57 = vld [vmem:[%s1475_s26 + $0x180] sm:$0xff]  ;;  %v255_v59 = vld [vmem:[%s1475_s26 + $0x188] sm:$0xff]  ;;  %v224_v60 = vld [vmem:[%s1475_s26 + $0x90] sm:$0xff] }
  0x67   : > { %v256_v61 = vld [vmem:[%s1475_s26 + $0x190] sm:$0xff]  ;;  %v225_v62 = vld [vmem:[%s1475_s26 + $0x98] sm:$0xff]  ;;  %v226_v0 = vld [vmem:[%s1475_s26 + $0xa0] sm:$0xff] }
  0x68   : > { %v257_v63 = vld [vmem:[%s1475_s26 + $0x198] sm:$0xff]  ;;  %v258_v1 = vld [vmem:[%s1475_s26 + $0x1a0] sm:$0xff]  ;;  %v227_v2 = vld [vmem:[%s1475_s26 + $0xa8] sm:$0xff] }
  0x69   : > { %1085 = vmatpush3.bf16.msra.mxu0 %v1082_v16  ;;  %1110 = vmatpush3.bf16.msra.mxu1 %v1082_v16  ;;  %v259_v3 = vld [vmem:[%s1475_s26 + $0x1a8] sm:$0xff]  ;;  %v228_v4 = vld [vmem:[%s1475_s26 + $0xb0] sm:$0xff]  ;;  %v229_v6 = vld [vmem:[%s1475_s26 + $0xb8] sm:$0xff] }
  0x6a   : > { %1087 = vmatprep.subr.bf16.mxu0 %v1086_v19  ;;  %1103 = vmatprep.subr.bf16.mxu1 %v1086_v19  ;;  %v260_v5 = vld [vmem:[%s1475_s26 + $0x1b0] sm:$0xff]  ;;  %v261_v7 = vld [vmem:[%s1475_s26 + $0x1b8] sm:$0xff]  ;;  %v230_v8 = vld [vmem:[%s1475_s26 + $0xc0] sm:$0xff] }
  0x6b   : > { %v262_v9 = vld [vmem:[%s1475_s26 + $0x1c0] sm:$0xff]  ;;  %v231_v10 = vld [vmem:[%s1475_s26 + $0xc8] sm:$0xff]  ;;  %v232_v12 = vld [vmem:[%s1475_s26 + $0xd0] sm:$0xff] }
  0x6c   : > { %v263_v11 = vld [vmem:[%s1475_s26 + $0x1c8] sm:$0xff]  ;;  %v264_v13 = vld [vmem:[%s1475_s26 + $0x1d0] sm:$0xff]  ;;  %v233_v14 = vld [vmem:[%s1475_s26 + $0xd8] sm:$0xff] }
  0x6d   : > { %1089 = vmatpush3.bf16.msra.mxu0 %v1086_v19  ;;  %1111 = vmatpush3.bf16.msra.mxu1 %v1086_v19  ;;  %v265_v15 = vld [vmem:[%s1475_s26 + $0x1d8] sm:$0xff]  ;;  %v234_v16 = vld [vmem:[%s1475_s26 + $0xe0] sm:$0xff]  ;;  %v235_v18 = vld [vmem:[%s1475_s26 + $0xe8] sm:$0xff] }
  0x6e   : > { %1091 = vmatprep.subr.bf16.mxu0 %v1090_v22  ;;  %1104 = vmatprep.subr.bf16.mxu1 %v1090_v22  ;;  %v266_v17 = vld [vmem:[%s1475_s26 + $0x1e0] sm:$0xff]  ;;  %v267_v19 = vld [vmem:[%s1475_s26 + $0x1e8] sm:$0xff]  ;;  %v236_v20 = vld [vmem:[%s1475_s26 + $0xf0] sm:$0xff] }
  0x6f   : > { %v268_v21 = vld [vmem:[%s1475_s26 + $0x1f0] sm:$0xff]  ;;  %v269_v23 = vld [vmem:[%s1475_s26 + $0x1f8] sm:$0xff]  ;;  %v1552_v24 = vld [vmem:[%s1738_s2] ss:$0 sm:$0xff] }
  0x71   : > { %1093 = vmatpush3.bf16.msra.mxu0 %v1090_v22  ;;  %1112 = vmatpush3.bf16.msra.mxu1 %v1090_v22  ;;  %v237_v22 = vld [vmem:[%s1475_s26 + $0xf8] sm:$0xff] }
  0x72   : > { %1095 = vmatprep.subr.bf16.mxu0 %v1094_v25  ;;  %1105 = vmatprep.subr.bf16.mxu1 %v1094_v25 }
  0x75   : > { %1097 = vmatpush3.bf16.msra.mxu0 %v1094_v25  ;;  %1113 = vmatpush3.bf16.msra.mxu1 %v1094_v25 }
  0x78   : > { %971 = vmatmul.mubr.f32.vlgmr.msra.gmra.mrb[0].mxu0 %v207_v26  ;;  %1019 = vmatmul.mubr.f32.vlgmr.msra.gmra.mrb[0].mxu1 %v239_v27 }
  0x79   : > { %973 = vmatprep.mubr.f32.mxu0 %v208_v28  ;;  %1021 = vmatprep.mubr.f32.mxu1 %v240_v29 }
  0x7c   : > { %974 = vmatmul.mubr.f32.gmra.mrb[2].mxu0 %v209_v30  ;;  %1022 = vmatmul.mubr.f32.gmra.mrb[2].mxu1 %v241_v31 }
  0x7d   : > { %976 = vmatprep.mubr.f32.mxu0 %v210_v32  ;;  %1024 = vmatprep.mubr.f32.mxu1 %v242_v33 }
  0x80   : > { %977 = vmatmul.mubr.f32.gmra.mrb[4].mxu0 %v211_v34  ;;  %1025 = vmatmul.mubr.f32.gmra.mrb[4].mxu1 %v243_v35 }
  0x81   : > { %979 = vmatprep.mubr.f32.mxu0 %v212_v36  ;;  %1027 = vmatprep.mubr.f32.mxu1 %v244_v37 }
  0x84   : > { %980 = vmatmul.mubr.f32.gmra.mrb[6].mxu0 %v213_v38  ;;  %1028 = vmatmul.mubr.f32.gmra.mrb[6].mxu1 %v245_v39 }
  0x85   : > { %982 = vmatprep.mubr.f32.mxu0 %v214_v40  ;;  %1030 = vmatprep.mubr.f32.mxu1 %v246_v41 }
  0x88   : > { %983 = vmatmul.mubr.f32.gmra.mrb[8].mxu0 %v215_v42  ;;  %1031 = vmatmul.mubr.f32.gmra.mrb[8].mxu1 %v247_v43 }
  0x89   : > { %985 = vmatprep.mubr.f32.mxu0 %v216_v44  ;;  %1033 = vmatprep.mubr.f32.mxu1 %v248_v45 }
  0x8c   : > { %986 = vmatmul.mubr.f32.gmra.mrb[10].mxu0 %v217_v46  ;;  %1034 = vmatmul.mubr.f32.gmra.mrb[10].mxu1 %v249_v47 }
  0x8d   : > { %988 = vmatprep.mubr.f32.mxu0 %v218_v48  ;;  %1036 = vmatprep.mubr.f32.mxu1 %v250_v49 }
  0x90   : > { %989 = vmatmul.mubr.f32.gmra.mrb[12].mxu0 %v219_v50  ;;  %1037 = vmatmul.mubr.f32.gmra.mrb[12].mxu1 %v251_v51 }
  0x91   : > { %991 = vmatprep.mubr.f32.mxu0 %v220_v52  ;;  %1039 = vmatprep.mubr.f32.mxu1 %v252_v53 }
  0x94   : > { %992 = vmatmul.mubr.f32.gmra.mrb[14].mxu0 %v221_v54  ;;  %1040 = vmatmul.mubr.f32.gmra.mrb[14].mxu1 %v253_v55 }
  0x95   : > { %994 = vmatprep.mubr.f32.mxu0 %v222_v56  ;;  %1042 = vmatprep.mubr.f32.mxu1 %v254_v57 }
  0x98   : > { %995 = vmatmul.mubr.f32.gmra.mrb[16].mxu0 %v223_v58  ;;  %1043 = vmatmul.mubr.f32.gmra.mrb[16].mxu1 %v255_v59 }
  0x99   : > { %997 = vmatprep.mubr.f32.mxu0 %v224_v60  ;;  %1045 = vmatprep.mubr.f32.mxu1 %v256_v61 }
  0x9c   : > { %998 = vmatmul.mubr.f32.gmra.mrb[18].mxu0 %v225_v62  ;;  %1046 = vmatmul.mubr.f32.gmra.mrb[18].mxu1 %v257_v63 }
  0x9d   : > { %1000 = vmatprep.mubr.f32.mxu0 %v226_v0  ;;  %1048 = vmatprep.mubr.f32.mxu1 %v258_v1 }
  0xa0   : > { %1001 = vmatmul.mubr.f32.gmra.mrb[20].mxu0 %v227_v2  ;;  %1049 = vmatmul.mubr.f32.gmra.mrb[20].mxu1 %v259_v3 }
  0xa1   : > { %1003 = vmatprep.mubr.f32.mxu0 %v228_v4  ;;  %1051 = vmatprep.mubr.f32.mxu1 %v260_v5 }
  0xa4   : > { %1004 = vmatmul.mubr.f32.gmra.mrb[22].mxu0 %v229_v6  ;;  %1052 = vmatmul.mubr.f32.gmra.mrb[22].mxu1 %v261_v7 }
  0xa5   : > { %1006 = vmatprep.mubr.f32.mxu0 %v230_v8  ;;  %1054 = vmatprep.mubr.f32.mxu1 %v262_v9 }
  0xa8   : > { %1007 = vmatmul.mubr.f32.gmra.mrb[24].mxu0 %v231_v10  ;;  %1055 = vmatmul.mubr.f32.gmra.mrb[24].mxu1 %v263_v11 }
  0xa9   : > { %1009 = vmatprep.mubr.f32.mxu0 %v232_v12  ;;  %1057 = vmatprep.mubr.f32.mxu1 %v264_v13 }
  0xac   : > { %1010 = vmatmul.mubr.f32.gmra.mrb[26].mxu0 %v233_v14  ;;  %1058 = vmatmul.mubr.f32.gmra.mrb[26].mxu1 %v265_v15 }
  0xad   : > { %1012 = vmatprep.mubr.f32.mxu0 %v234_v16  ;;  %1060 = vmatprep.mubr.f32.mxu1 %v266_v17 }
  0xb0   : > { %1013 = vmatmul.mubr.f32.gmra.mrb[28].mxu0 %v235_v18  ;;  %1061 = vmatmul.mubr.f32.gmra.mrb[28].mxu1 %v267_v19 }
  0xb1   : > { %1015 = vmatprep.mubr.f32.mxu0 %v236_v20  ;;  %1063 = vmatprep.mubr.f32.mxu1 %v268_v21 }
  0xb4   : > { %1016 = vmatmul.mubr.f32.gmra.mrb[30].mxu0 %v237_v22  ;;  %1064 = vmatmul.mubr.f32.gmra.mrb[30].mxu1 %v269_v23 }
 0x14b   : > { %v972_v25 = vpop.f32.mrb[0].mxu0  ;;  %v1020_v26 = vpop.f32.mrb[0].mxu1 }
 0x14c   : > { %v365_v27 = vadd.f32 %v972_v25, %v1552_v24  ;;  %v525_v28 = vadd.f32 %v1020_v26, %v1552_v24  ;;  %v359_v29 = vpop.f32.mrb[1].mxu0  ;;  %v519_v30 = vpop.f32.mrb[1].mxu1 }
 0x14d   : > { %v360_v31 = vadd.f32 %v1552_v24, %v359_v29  ;;  %v520_v32 = vadd.f32 %v1552_v24, %v519_v30 }
 0x14e   : > { %679 = vst [vmem:[%s1560_s8 + $0x8] sm:$0xff] %v365_v27  ;;  %711 = vst [vmem:[%s1560_s8 + $0x108] sm:$0xff] %v525_v28 }
 0x14f   : > { %678 = vst [vmem:[%s1560_s8] sm:$0xff] %v360_v31  ;;  %710 = vst [vmem:[%s1560_s8 + $0x100] sm:$0xff] %v520_v32  ;;  %v975_v33 = vpop.f32.mrb[2].mxu0  ;;  %v1023_v34 = vpop.f32.mrb[2].mxu1 }
 0x150   : > { %v375_v35 = vadd.f32 %v975_v33, %v1552_v24  ;;  %v535_v36 = vadd.f32 %v1023_v34, %v1552_v24  ;;  %v369_v37 = vpop.f32.mrb[3].mxu0  ;;  %v529_v38 = vpop.f32.mrb[3].mxu1 }
 0x151   : > { %v370_v39 = vadd.f32 %v1552_v24, %v369_v37  ;;  %v530_v40 = vadd.f32 %v1552_v24, %v529_v38 }
 0x152   : > { %681 = vst [vmem:[%s1560_s8 + $0x18] sm:$0xff] %v375_v35  ;;  %713 = vst [vmem:[%s1560_s8 + $0x118] sm:$0xff] %v535_v36 }
 0x153   : > { %680 = vst [vmem:[%s1560_s8 + $0x10] sm:$0xff] %v370_v39  ;;  %712 = vst [vmem:[%s1560_s8 + $0x110] sm:$0xff] %v530_v40  ;;  %v978_v41 = vpop.f32.mrb[4].mxu0  ;;  %v1026_v42 = vpop.f32.mrb[4].mxu1 }
 0x154   : > { %v385_v43 = vadd.f32 %v978_v41, %v1552_v24  ;;  %v545_v44 = vadd.f32 %v1026_v42, %v1552_v24  ;;  %v379_v45 = vpop.f32.mrb[5].mxu0  ;;  %v539_v46 = vpop.f32.mrb[5].mxu1 }
 0x155   : > { %v380_v47 = vadd.f32 %v1552_v24, %v379_v45  ;;  %v540_v48 = vadd.f32 %v1552_v24, %v539_v46 }
 0x156   : > { %683 = vst [vmem:[%s1560_s8 + $0x28] sm:$0xff] %v385_v43  ;;  %715 = vst [vmem:[%s1560_s8 + $0x128] sm:$0xff] %v545_v44 }
 0x157   : > { %682 = vst [vmem:[%s1560_s8 + $0x20] sm:$0xff] %v380_v47  ;;  %714 = vst [vmem:[%s1560_s8 + $0x120] sm:$0xff] %v540_v48  ;;  %v981_v49 = vpop.f32.mrb[6].mxu0  ;;  %v1029_v50 = vpop.f32.mrb[6].mxu1 }
 0x158   : > { %v395_v51 = vadd.f32 %v981_v49, %v1552_v24  ;;  %v555_v52 = vadd.f32 %v1029_v50, %v1552_v24  ;;  %v389_v53 = vpop.f32.mrb[7].mxu0  ;;  %v549_v54 = vpop.f32.mrb[7].mxu1 }
 0x159   : > { %v390_v55 = vadd.f32 %v1552_v24, %v389_v53  ;;  %v550_v56 = vadd.f32 %v1552_v24, %v549_v54 }
 0x15a   : > { %685 = vst [vmem:[%s1560_s8 + $0x38] sm:$0xff] %v395_v51  ;;  %717 = vst [vmem:[%s1560_s8 + $0x138] sm:$0xff] %v555_v52 }
 0x15b   : > { %684 = vst [vmem:[%s1560_s8 + $0x30] sm:$0xff] %v390_v55  ;;  %716 = vst [vmem:[%s1560_s8 + $0x130] sm:$0xff] %v550_v56  ;;  %v984_v57 = vpop.f32.mrb[8].mxu0  ;;  %v1032_v58 = vpop.f32.mrb[8].mxu1 }
 0x15c   : > { %v405_v59 = vadd.f32 %v984_v57, %v1552_v24  ;;  %v565_v60 = vadd.f32 %v1032_v58, %v1552_v24  ;;  %v399_v61 = vpop.f32.mrb[9].mxu0  ;;  %v559_v62 = vpop.f32.mrb[9].mxu1 }
 0x15d   : > { %v400_v63 = vadd.f32 %v1552_v24, %v399_v61  ;;  %v560_v0 = vadd.f32 %v1552_v24, %v559_v62 }
 0x15e   : > { %687 = vst [vmem:[%s1560_s8 + $0x48] sm:$0xff] %v405_v59  ;;  %719 = vst [vmem:[%s1560_s8 + $0x148] sm:$0xff] %v565_v60 }
 0x15f   : > { %686 = vst [vmem:[%s1560_s8 + $0x40] sm:$0xff] %v400_v63  ;;  %718 = vst [vmem:[%s1560_s8 + $0x140] sm:$0xff] %v560_v0  ;;  %v987_v1 = vpop.f32.mrb[10].mxu0  ;;  %v1035_v2 = vpop.f32.mrb[10].mxu1 }
 0x160   : > { %v415_v3 = vadd.f32 %v987_v1, %v1552_v24  ;;  %v575_v4 = vadd.f32 %v1035_v2, %v1552_v24  ;;  %v409_v5 = vpop.f32.mrb[11].mxu0  ;;  %v569_v6 = vpop.f32.mrb[11].mxu1 }
 0x161   : > { %v410_v7 = vadd.f32 %v1552_v24, %v409_v5  ;;  %v570_v8 = vadd.f32 %v1552_v24, %v569_v6 }
 0x162   : > { %689 = vst [vmem:[%s1560_s8 + $0x58] sm:$0xff] %v415_v3  ;;  %721 = vst [vmem:[%s1560_s8 + $0x158] sm:$0xff] %v575_v4 }
 0x163   : > { %688 = vst [vmem:[%s1560_s8 + $0x50] sm:$0xff] %v410_v7  ;;  %720 = vst [vmem:[%s1560_s8 + $0x150] sm:$0xff] %v570_v8  ;;  %v990_v9 = vpop.f32.mrb[12].mxu0  ;;  %v1038_v10 = vpop.f32.mrb[12].mxu1 }
 0x164   : > { %v425_v11 = vadd.f32 %v990_v9, %v1552_v24  ;;  %v585_v12 = vadd.f32 %v1038_v10, %v1552_v24  ;;  %v419_v13 = vpop.f32.mrb[13].mxu0  ;;  %v579_v14 = vpop.f32.mrb[13].mxu1 }
 0x165   : > { %v420_v15 = vadd.f32 %v1552_v24, %v419_v13  ;;  %v580_v16 = vadd.f32 %v1552_v24, %v579_v14 }
 0x166   : > { %691 = vst [vmem:[%s1560_s8 + $0x68] sm:$0xff] %v425_v11  ;;  %723 = vst [vmem:[%s1560_s8 + $0x168] sm:$0xff] %v585_v12 }
 0x167   : > { %690 = vst [vmem:[%s1560_s8 + $0x60] sm:$0xff] %v420_v15  ;;  %722 = vst [vmem:[%s1560_s8 + $0x160] sm:$0xff] %v580_v16  ;;  %v993_v17 = vpop.f32.mrb[14].mxu0  ;;  %v1041_v18 = vpop.f32.mrb[14].mxu1 }
 0x168   : > { %v435_v19 = vadd.f32 %v993_v17, %v1552_v24  ;;  %v595_v20 = vadd.f32 %v1041_v18, %v1552_v24  ;;  %v429_v21 = vpop.f32.mrb[15].mxu0  ;;  %v589_v22 = vpop.f32.mrb[15].mxu1 }
 0x169   : > { %v430_v23 = vadd.f32 %v1552_v24, %v429_v21  ;;  %v590_v25 = vadd.f32 %v1552_v24, %v589_v22 }
 0x16a   : > { %693 = vst [vmem:[%s1560_s8 + $0x78] sm:$0xff] %v435_v19  ;;  %725 = vst [vmem:[%s1560_s8 + $0x178] sm:$0xff] %v595_v20 }
 0x16b   : > { %692 = vst [vmem:[%s1560_s8 + $0x70] sm:$0xff] %v430_v23  ;;  %724 = vst [vmem:[%s1560_s8 + $0x170] sm:$0xff] %v590_v25  ;;  %v996_v26 = vpop.f32.mrb[16].mxu0  ;;  %v1044_v27 = vpop.f32.mrb[16].mxu1 }
 0x16c   : > { %v445_v28 = vadd.f32 %v996_v26, %v1552_v24  ;;  %v605_v29 = vadd.f32 %v1044_v27, %v1552_v24  ;;  %v439_v30 = vpop.f32.mrb[17].mxu0  ;;  %v599_v31 = vpop.f32.mrb[17].mxu1 }
 0x16d   : > { %v440_v32 = vadd.f32 %v1552_v24, %v439_v30  ;;  %v600_v33 = vadd.f32 %v1552_v24, %v599_v31 }
 0x16e   : > { %695 = vst [vmem:[%s1560_s8 + $0x88] sm:$0xff] %v445_v28  ;;  %727 = vst [vmem:[%s1560_s8 + $0x188] sm:$0xff] %v605_v29 }
 0x16f   : > { %694 = vst [vmem:[%s1560_s8 + $0x80] sm:$0xff] %v440_v32  ;;  %726 = vst [vmem:[%s1560_s8 + $0x180] sm:$0xff] %v600_v33  ;;  %v999_v34 = vpop.f32.mrb[18].mxu0  ;;  %v1047_v35 = vpop.f32.mrb[18].mxu1 }
 0x170   : > { %v455_v36 = vadd.f32 %v999_v34, %v1552_v24  ;;  %v615_v37 = vadd.f32 %v1047_v35, %v1552_v24  ;;  %v449_v38 = vpop.f32.mrb[19].mxu0  ;;  %v609_v39 = vpop.f32.mrb[19].mxu1 }
 0x171   : > { %v450_v40 = vadd.f32 %v1552_v24, %v449_v38  ;;  %v610_v41 = vadd.f32 %v1552_v24, %v609_v39 }
 0x172   : > { %697 = vst [vmem:[%s1560_s8 + $0x98] sm:$0xff] %v455_v36  ;;  %729 = vst [vmem:[%s1560_s8 + $0x198] sm:$0xff] %v615_v37 }
 0x173   : > { %696 = vst [vmem:[%s1560_s8 + $0x90] sm:$0xff] %v450_v40  ;;  %728 = vst [vmem:[%s1560_s8 + $0x190] sm:$0xff] %v610_v41  ;;  %v1002_v42 = vpop.f32.mrb[20].mxu0  ;;  %v1050_v43 = vpop.f32.mrb[20].mxu1 }
 0x174   : > { %v465_v44 = vadd.f32 %v1002_v42, %v1552_v24  ;;  %v625_v45 = vadd.f32 %v1050_v43, %v1552_v24  ;;  %v459_v46 = vpop.f32.mrb[21].mxu0  ;;  %v619_v47 = vpop.f32.mrb[21].mxu1 }
 0x175   : > { %v460_v48 = vadd.f32 %v1552_v24, %v459_v46  ;;  %v620_v49 = vadd.f32 %v1552_v24, %v619_v47 }
 0x176   : > { %699 = vst [vmem:[%s1560_s8 + $0xa8] sm:$0xff] %v465_v44  ;;  %731 = vst [vmem:[%s1560_s8 + $0x1a8] sm:$0xff] %v625_v45 }
 0x177   : > { %698 = vst [vmem:[%s1560_s8 + $0xa0] sm:$0xff] %v460_v48  ;;  %730 = vst [vmem:[%s1560_s8 + $0x1a0] sm:$0xff] %v620_v49  ;;  %v1005_v50 = vpop.f32.mrb[22].mxu0  ;;  %v1053_v51 = vpop.f32.mrb[22].mxu1 }
 0x178   : > { %v475_v52 = vadd.f32 %v1005_v50, %v1552_v24  ;;  %v635_v53 = vadd.f32 %v1053_v51, %v1552_v24  ;;  %v469_v54 = vpop.f32.mrb[23].mxu0  ;;  %v629_v55 = vpop.f32.mrb[23].mxu1 }
 0x179   : > { %v470_v56 = vadd.f32 %v1552_v24, %v469_v54  ;;  %v630_v57 = vadd.f32 %v1552_v24, %v629_v55 }
 0x17a   : > { %701 = vst [vmem:[%s1560_s8 + $0xb8] sm:$0xff] %v475_v52  ;;  %733 = vst [vmem:[%s1560_s8 + $0x1b8] sm:$0xff] %v635_v53 }
 0x17b   : > { %700 = vst [vmem:[%s1560_s8 + $0xb0] sm:$0xff] %v470_v56  ;;  %732 = vst [vmem:[%s1560_s8 + $0x1b0] sm:$0xff] %v630_v57  ;;  %v1008_v58 = vpop.f32.mrb[24].mxu0  ;;  %v1056_v59 = vpop.f32.mrb[24].mxu1 }
 0x17c   : > { %v485_v60 = vadd.f32 %v1008_v58, %v1552_v24  ;;  %v645_v61 = vadd.f32 %v1056_v59, %v1552_v24  ;;  %v479_v62 = vpop.f32.mrb[25].mxu0  ;;  %v639_v63 = vpop.f32.mrb[25].mxu1 }
 0x17d   : > { %v480_v0 = vadd.f32 %v1552_v24, %v479_v62  ;;  %v640_v1 = vadd.f32 %v1552_v24, %v639_v63 }
 0x17e   : > { %703 = vst [vmem:[%s1560_s8 + $0xc8] sm:$0xff] %v485_v60  ;;  %735 = vst [vmem:[%s1560_s8 + $0x1c8] sm:$0xff] %v645_v61 }
 0x17f   : > { %702 = vst [vmem:[%s1560_s8 + $0xc0] sm:$0xff] %v480_v0  ;;  %734 = vst [vmem:[%s1560_s8 + $0x1c0] sm:$0xff] %v640_v1  ;;  %v1011_v2 = vpop.f32.mrb[26].mxu0  ;;  %v1059_v3 = vpop.f32.mrb[26].mxu1 }
 0x180   : > { %v495_v4 = vadd.f32 %v1011_v2, %v1552_v24  ;;  %v655_v5 = vadd.f32 %v1059_v3, %v1552_v24  ;;  %v489_v6 = vpop.f32.mrb[27].mxu0  ;;  %v649_v7 = vpop.f32.mrb[27].mxu1 }
 0x181   : > { %v490_v8 = vadd.f32 %v1552_v24, %v489_v6  ;;  %v650_v9 = vadd.f32 %v1552_v24, %v649_v7 }
 0x182   : > { %705 = vst [vmem:[%s1560_s8 + $0xd8] sm:$0xff] %v495_v4  ;;  %737 = vst [vmem:[%s1560_s8 + $0x1d8] sm:$0xff] %v655_v5 }
 0x183   : > { %704 = vst [vmem:[%s1560_s8 + $0xd0] sm:$0xff] %v490_v8  ;;  %736 = vst [vmem:[%s1560_s8 + $0x1d0] sm:$0xff] %v650_v9  ;;  %v1014_v10 = vpop.f32.mrb[28].mxu0  ;;  %v1062_v11 = vpop.f32.mrb[28].mxu1 }
 0x184   : > { %v505_v12 = vadd.f32 %v1014_v10, %v1552_v24  ;;  %v665_v13 = vadd.f32 %v1062_v11, %v1552_v24  ;;  %v499_v14 = vpop.f32.mrb[29].mxu0  ;;  %v659_v15 = vpop.f32.mrb[29].mxu1 }
 0x185   : > { %v500_v16 = vadd.f32 %v1552_v24, %v499_v14  ;;  %v660_v17 = vadd.f32 %v1552_v24, %v659_v15 }
 0x186   : > { %707 = vst [vmem:[%s1560_s8 + $0xe8] sm:$0xff] %v505_v12  ;;  %739 = vst [vmem:[%s1560_s8 + $0x1e8] sm:$0xff] %v665_v13 }
 0x187   : > { %706 = vst [vmem:[%s1560_s8 + $0xe0] sm:$0xff] %v500_v16  ;;  %738 = vst [vmem:[%s1560_s8 + $0x1e0] sm:$0xff] %v660_v17  ;;  %v1017_v18 = vpop.f32.mrb[30].mxu0  ;;  %v1065_v19 = vpop.f32.mrb[30].mxu1 }
 0x188   : > { %v515_v20 = vadd.f32 %v1017_v18, %v1552_v24  ;;  %v675_v21 = vadd.f32 %v1065_v19, %v1552_v24  ;;  %v509_v22 = vpop.f32.mrb[31].mxu0  ;;  %v669_v23 = vpop.f32.mrb[31].mxu1 }
 0x189   : > { %v510_v25 = vadd.f32 %v1552_v24, %v509_v22  ;;  %v670_v26 = vadd.f32 %v1552_v24, %v669_v23 }
 0x18a   : > { %709 = vst [vmem:[%s1560_s8 + $0xf8] sm:$0xff] %v515_v20  ;;  %741 = vst [vmem:[%s1560_s8 + $0x1f8] sm:$0xff] %v675_v21 }
 0x18b   : > { %708 = vst [vmem:[%s1560_s8 + $0xf0] sm:$0xff] %v510_v25  ;;  %740 = vst [vmem:[%s1560_s8 + $0x1f0] sm:$0xff] %v670_v26 }
 0x18c   : > { %1246 = shalt.err (!%p1243_p7)
}
 0x18d   : > { %s1247_s30 = scalar_lea.hbm %s1685_s5, 8192  ;;  %s1251_s10 = scalar_lea.hbm %s1739_s3, 32768 }
 0x18e   : > { %p1248_p9 = scmp.ne.s32.totalorder %s1685_s5, %s1247_s30  ;;  %p1252_p5 = scmp.lt.u32.totalorder %s1685_s5, %s1739_s3 }
 0x18f   : > { %p1253_p10 = scmp.lt.u32.totalorder %s1251_s10, %s1247_s30  ;;  %p1255_p4 = scmp.lt.u32.totalorder %s1247_s30, %s1685_s5 }
 0x190   : > { %p1249_p1 = pnand %p1248_p9, %p1418_p12 }
 0x191   : > { %p1254_p2 = por %p1253_p10, %p1252_p5 }
 0x192   : > { %p1250_p0 = pneg %p1249_p1 }
 0x193   : > { %p1256_p6 = por %p1255_p4, %p1254_p2 }
 0x195   : > { %p1257_p8 = pnand %p1256_p6, %p1250_p0 }
 0x197   : > { %1260 = shalt.err (!%p1257_p8)
}
 0x198   : > { %s1310_s20 = smov 128   ;;  %s1311_s8 = smov 8  }
 0x199   : > { %1120 = dma.vmem_to_hbm [thread:$0]  (%p1418_p12), %s1687_s4, 8192, %s1685_s5, %s743_s11, %s1310_s20, %s1310_s20, %s1311_s8  }
 0x19a PF: > { %p1137_p11 = scmp.ge.s32.totalorder %s1303_s15, 2  ;;  %s771_s9 = sand.u32 1, %s1291_s12  }
 0x19b   : > { %p1754_p13 = scmp.ne.s32.totalorder %s1744_s19, 0  ;;  %s772_s16 = scalar_lea.sflag [#allocation4], %s771_s9 }
 0x19d   : > { %p1131_p3 = pnand %p1137_p11, %p1754_p13 }
 0x19f   : > { %1286 = dma.done.wait (!%p1131_p3), %s772_s16, 8192  }
 0x1a0   : > { %1288 = vsyncadd (!%p1131_p3), %s772_s16, 4294959104  ;;  %p17_p7 = scmp.ge.s32.totalorder %s1385_s24, 6   ;;  %s1755_s12 = smov %s1295_s13 }
 0x1a1   : > { %s1756_s13 = smov %s1299_s14  ;;  %s1757_s14 = smov %s1414_s17 }
 0x1a2   : > { %s1758_s15 = smov %s1385_s24  ;;  %19 = sbr.rel (!%p17_p7) target bundleno = 6 (0x6), region = 81 }
 0x1a9   :  { %777 = vsyncpa [#allocation3], 1 }
 0x1aa   :  { %779 = vsyncpa [#allocation3 + $0x1], 1 }
 0x1ab   :  { %780 = vsyncpa [#allocation6], 1 }
 0x1ac   :  { %781 = vsyncpa [#allocation4], 1 }
 0x1ad   :  { %783 = vsyncpa [#allocation4 + $0x1], 1 }

</bundles_post_ra>
